<compile_context>
chip_gen: v7x
topology: tpu7x:2x2x1
jax: 0.10.0
libtpu: 0.0.40
codegen_flags: <defaults>
</compile_context>

<pallas_src>
import functools

import jax
import jax.numpy as jnp
from jax.experimental import pallas as pl
from jax.experimental.pallas import tpu as pltpu


# ----------------------------------------------------------------------------
# VMEM sizing (generation-aware).
# ----------------------------------------------------------------------------
def _query_vmem_capacity():
    try:
        info = pltpu.get_tpu_info()
        for attr in ("vmem_capacity_bytes", "vmem_bytes", "vmem_size_bytes"):
            v = getattr(info, attr, None)
            if isinstance(v, int) and v > 0:
                return v
    except Exception:
        pass
    return 64 * 1024 * 1024              # conservative default (v7x-sized)


def _vmem_config():
    cap = _query_vmem_capacity()
    # ~75% of physical, capped at 64 MiB; tile budget ~55% of the limit so
    # double-buffering + f32 temporaries + compiler scratch always fit.
    limit = min(int(cap) * 3 // 4, 64 * 1024 * 1024)
    budget = max(int(limit * 0.55), 2 * 1024 * 1024)
    return limit, budget


def _pick_tb(B, per_batch_bytes, budget):
    """Largest divisor of B whose block fits; prefer >=4 grid steps (v7x)."""
    divisors = [d for d in range(1, B + 1) if B % d == 0]
    fitting = [d for d in divisors if d * per_batch_bytes <= budget] or [1]
    for min_steps in (4, 2):
        pref = [d for d in fitting if B // d >= min_steps]
        if pref:
            return max(pref)
    return max(fitting)


def _pick_hw_tile(hw_pad, bytes_per_hw, budget, other_par_steps):
    """Largest multiple-of-128 divisor of hw_pad that fits and keeps >=4
    (then >=2) total parallel grid steps."""
    cands = [t for t in range(128, hw_pad + 1, 128) if hw_pad % t == 0]
    fitting = [t for t in cands if t * bytes_per_hw <= budget] or [cands[0]]
    for min_steps in (4, 2, 1):
        pref = [t for t in fitting if other_par_steps * (hw_pad // t) >= min_steps]
        if pref:
            return max(pref)
    return max(fitting)


def _pick_tc(C, B, itemsize, budget):
    """Split C into 128-multiples only if needed to fit a minimal apply block."""
    if C % 128 != 0 or C <= 128 or 4 * B * C * 128 * itemsize <= budget:
        return C
    tcs = [t for t in range(128, C, 128) if C % t == 0]
    fitting = [t for t in tcs if 4 * B * t * 128 * itemsize <= budget]
    return max(fitting) if fitting else min(tcs)


# ----------------------------------------------------------------------------
# Fused single-pass kernel: read x once, write once.
# ----------------------------------------------------------------------------
def _fused_kernel(x_ref, w1t_ref, b1_ref, w2t_ref, b2_ref, out_ref, *, inv_hw):
    x = x_ref[...]                                            # (TB, C, HW)
    # f32 accumulation (exact for f32 inputs, required for bf16 inputs).
    avg = jnp.sum(x.astype(jnp.float32), axis=-1) * inv_hw    # (TB, C)
    mx = jnp.max(x, axis=-1).astype(jnp.float32)              # (TB, C)

    w1t = w1t_ref[...]
    b1 = b1_ref[...]
    w2t = w2t_ref[...]
    b2 = b2_ref[...]

    def mlp(p):
        h = jnp.maximum(jnp.dot(p, w1t, preferred_element_type=jnp.float32) + b1, 0.0)
        return jnp.dot(h, w2t, preferred_element_type=jnp.float32) + b2

    # Cast scale once so the gating multiply runs in x's dtype (bf16 on v6e/v7x).
    scale = jax.nn.sigmoid(mlp(avg) + mlp(mx)).astype(x.dtype)   # (TB, C)
    out_ref[...] = (x * scale[:, :, None]).astype(out_ref.dtype)


def _channel_gate_fused(x3, w1t, b1r, w2t, b2r, tb, limit):
    B, C, HW = x3.shape
    Cr = w1t.shape[1]
    itemsize = jnp.dtype(x3.dtype).itemsize
    cost = pl.CostEstimate(
        flops=int(3 * B * C * HW + 8 * B * C * Cr),
        transcendentals=int(B * C),
        bytes_accessed=int(2 * B * C * HW * itemsize + 4 * (2 * C * Cr + C + Cr)))

    full = lambda shape: pl.BlockSpec(shape, lambda b: (0,) * len(shape))
    return pl.pallas_call(
        functools.partial(_fused_kernel, inv_hw=1.0 / HW),
        out_shape=jax.ShapeDtypeStruct((B, C, HW), x3.dtype),
        grid=(B // tb,),
        in_specs=[
            pl.BlockSpec((tb, C, HW), lambda b: (b, 0, 0)),   # x
            full((C, Cr)),                                    # W1^T
            full((1, Cr)),                                    # b1
            full((Cr, C)),                                    # W2^T
            full((1, C)),                                     # b2
        ],
        out_specs=pl.BlockSpec((tb, C, HW), lambda b: (b, 0, 0)),
        compiler_params=pltpu.CompilerParams(
            dimension_semantics=("parallel",),
            vmem_limit_bytes=limit),
        cost_estimate=cost,
        input_output_aliases={0: 0},          # out overwrites x's HBM buffer
    )(x3, w1t, b1r, w2t, b2r)


# ----------------------------------------------------------------------------
# Two-pass tiled path for large C*HW.
#   Pass 1: per-HW-group partial sum/max pooling (all grid axes parallel).
#   (plain JAX): reduce partials, tiny MLP + sigmoid -> scale (B, C).
#   Pass 2: streaming broadcast-multiply.
# ----------------------------------------------------------------------------
def _pool_kernel(x_ref, sum_ref, max_ref, *, hw_true, hw_tile):
    x = x_ref[...]                                       # (B, TC, HW_T)
    if hw_true is not None:
        # Zero padding is harmless for the sum, but not for the max: mask it.
        base = pl.program_id(1) * hw_tile
        idx = base + jax.lax.broadcasted_iota(jnp.int32, x.shape, 2)
        xm = jnp.where(idx < hw_true, x, -jnp.inf)
    else:
        xm = x
    sum_ref[...] = jnp.sum(x.astype(jnp.float32), axis=-1)[None]     # (1, B, TC)
    max_ref[...] = jnp.max(xm, axis=-1).astype(jnp.float32)[None]    # (1, B, TC)


def _apply_scale_kernel(x_ref, scale_ref, out_ref):
    out_ref[...] = (x_ref[...] * scale_ref[...][:, :, None]).astype(out_ref.dtype)


def _channel_gate_tiled(x3, params, budget, limit):
    w1, b1, w2, b2 = params
    B, C, HW = x3.shape
    itemsize = jnp.dtype(x3.dtype).itemsize

    # Lane-dense padding of the flattened spatial axis (multiply-by-scale on
    # zero pad is zero; only the max pool needs in-kernel masking).
    hw_pad = ((HW + 127) // 128) * 128
    padded = hw_pad != HW
    x_pad = jnp.pad(x3, ((0, 0), (0, 0), (0, hw_pad - HW))) if padded else x3

    tc = _pick_tc(C, B, itemsize, budget)
    n_c = C // tc

    # Pass 1 double-buffers only the input (2x); pass 2 input + output (4x),
    # so the pooling pass gets a ~2x larger HW tile (fewer, longer DMAs).
    hw_pool = _pick_hw_tile(hw_pad, 2 * B * tc * itemsize, budget, n_c)
    hw_apply = _pick_hw_tile(hw_pad, 4 * B * tc * itemsize, budget, n_c)
    n_pool = hw_pad // hw_pool

    pool_cost = pl.CostEstimate(
        flops=int(2 * B * C * hw_pad),
        transcendentals=0,
        bytes_accessed=int(B * C * hw_pad * itemsize + 2 * n_pool * B * C * 4))

    partial_sum, partial_max = pl.pallas_call(
        functools.partial(_pool_kernel,
                          hw_true=HW if padded else None, hw_tile=hw_pool),
        out_shape=(jax.ShapeDtypeStruct((n_pool, B, C), jnp.float32),
                   jax.ShapeDtypeStruct((n_pool, B, C), jnp.float32)),
        grid=(n_c, n_pool),
        in_specs=[pl.BlockSpec((B, tc, hw_pool), lambda c, h: (0, c, h))],
        out_specs=(pl.BlockSpec((1, B, tc), lambda c, h: (h, 0, c)),
                   pl.BlockSpec((1, B, tc), lambda c, h: (h, 0, c))),
        compiler_params=pltpu.CompilerParams(
            dimension_semantics=("parallel", "parallel"),
            vmem_limit_bytes=limit),
        cost_estimate=pool_cost,
    )(x_pad)

    # Tiny shared MLP + sigmoid on (B, C) pooled tensors in plain JAX.
    avg = partial_sum.sum(axis=0) * (1.0 / HW)       # (B, C) f32
    mx = partial_max.max(axis=0)                     # (B, C) f32

    def mlp(p):
        h = jnp.maximum(p @ w1.T + b1, 0.0)
        return h @ w2.T + b2

    scale = jax.nn.sigmoid(mlp(avg) + mlp(mx)).astype(x3.dtype)    # (B, C)

    apply_cost = pl.CostEstimate(
        flops=int(B * C * hw_pad),
        transcendentals=0,
        bytes_accessed=int(2 * B * C * hw_pad * itemsize + B * C * itemsize))

    out_pad = pl.pallas_call(
        _apply_scale_kernel,
        out_shape=jax.ShapeDtypeStruct((B, C, hw_pad), x3.dtype),
        grid=(n_c, hw_pad // hw_apply),
        in_specs=[
            pl.BlockSpec((B, tc, hw_apply), lambda c, h: (0, c, h)),   # x
            pl.BlockSpec((B, tc), lambda c, h: (0, c)),                # scale
        ],
        out_specs=pl.BlockSpec((B, tc, hw_apply), lambda c, h: (0, c, h)),
        compiler_params=pltpu.CompilerParams(
            dimension_semantics=("parallel", "parallel"),
            vmem_limit_bytes=limit),
        cost_estimate=apply_cost,
        input_output_aliases={0: 0},
    )(x_pad, scale)

    return out_pad[:, :, :HW] if padded else out_pad


# ----------------------------------------------------------------------------
# Public wrapper
# ----------------------------------------------------------------------------
def channel_gate(x_nchw, params, *, force_tiled=False):
    """ChannelGate forward.  x_nchw: (B, C, H, W) -> same shape/dtype."""
    w1, b1, w2, b2 = params
    B, C, H, W = x_nchw.shape
    HW = H * W
    Cr = w1.shape[0]
    x3 = x_nchw.reshape(B, C, HW)
    itemsize = jnp.dtype(x3.dtype).itemsize
    limit, budget = _vmem_config()

    # Fused-path footprint per batch element: in + out, double-buffered, with
    # lane/sublane padding and room for an f32 temporary when x is sub-32-bit.
    hw_lanes = ((HW + 127) // 128) * 128
    c_sub = ((C + 7) // 8) * 8
    per_elem = 4 * itemsize + (4 if itemsize < 4 else 0)
    per_batch_bytes = per_elem * c_sub * hw_lanes

    if not force_tiled and per_batch_bytes <= budget:
        # Pre-transpose the tiny MLP weights on the host (no in-kernel XLU
        # transpose); biases as 2-D rows so they are single small VMEM blocks.
        w1t = w1.T                      # (C, Cr)
        w2t = w2.T                      # (Cr, C)
        b1r = b1.reshape(1, Cr)
        b2r = b2.reshape(1, C)
        tb = _pick_tb(B, per_batch_bytes, budget)
        out3 = _channel_gate_fused(x3, w1t, b1r, w2t, b2r, tb, limit)
    else:
        out3 = _channel_gate_tiled(x3, params, budget, limit)
    return out3.reshape(B, C, H, W)


# ----------------------------------------------------------------------------
# Pure-JAX reference mirroring the PyTorch module, and parameter init.
# ----------------------------------------------------------------------------
def reference_forward(x_nchw, params):
    w1, b1, w2, b2 = params
    B, C, H, W = x_nchw.shape
    xf = x_nchw.reshape(B, C, H * W)
    avg = xf.mean(axis=-1)
    mx = xf.max(axis=-1)

    def mlp(p):
        h = jnp.maximum(p @ w1.T + b1, 0.0)
        return h @ w2.T + b2

    scale = jax.nn.sigmoid(mlp(avg) + mlp(mx))
    return x_nchw * scale[:, :, None, None]


def make_params(key, gate_channels, reduction_ratio):
    cr = gate_channels // reduction_ratio
    ks = jax.random.split(key, 4)
    s = 0.2
    w1 = s * jax.random.normal(ks[0], (cr, gate_channels), jnp.float32)
    b1 = s * jax.random.normal(ks[1], (cr,), jnp.float32)
    w2 = s * jax.random.normal(ks[2], (gate_channels, cr), jnp.float32)
    b2 = s * jax.random.normal(ks[3], (gate_channels,), jnp.float32)
    return (w1, b1, w2, b2)


if __name__ == "__main__":
    key = jax.random.PRNGKey(0)
    kx, kp, kx2, kp2 = jax.random.split(key, 4)

    # Shape 1: fused single-pass path (auto-selected at this size).
    B, C, H, W = 2, 32, 16, 16               # gate_channels=32, hidden=4
    x = jax.random.normal(kx, (B, C, H, W), jnp.float32)
    params = make_params(kp, C, 8)
    ref = reference_forward(x, params)
    out_fused = jax.block_until_ready(channel_gate(x, params))
    assert out_fused.shape == (B, C, H, W)
    assert jnp.allclose(out_fused, ref, atol=1e-4, rtol=1e-4), \
        "fused kernel mismatch vs JAX reference"

    # Shape 2: exercise the two-pass tiled path, including non-128-multiple
    # H*W padding (HW=144 -> 256), at a still-small size.
    B2, C2, H2, W2 = 1, 256, 12, 12
    x2 = jax.random.normal(kx2, (B2, C2, H2, W2), jnp.float32)
    params2 = make_params(kp2, C2, 16)
    ref2 = reference_forward(x2, params2)
    out_tiled = jax.block_until_ready(channel_gate(x2, params2, force_tiled=True))
    assert out_tiled.shape == (B2, C2, H2, W2)
    assert jnp.allclose(out_tiled, ref2, atol=1e-4, rtol=1e-4), \
        "tiled kernel mismatch vs JAX reference"

    print("KERNEL_OK")
</pallas_src>

<mosaic_0001>
module attributes {stable_mosaic.version = 11 : i64} {
  func.func @_fused_kernel(%arg0: i32, %arg1: memref<1x32x256xf32, #tpu.memory_space<vmem>>, %arg2: memref<32x4xf32, #tpu.memory_space<vmem>>, %arg3: memref<1x4xf32, #tpu.memory_space<vmem>>, %arg4: memref<4x32xf32, #tpu.memory_space<vmem>>, %arg5: memref<1x32xf32, #tpu.memory_space<vmem>>, %arg6: memref<1x32x256xf32, #tpu.memory_space<vmem>>) attributes {dimension_semantics = [#tpu.dimension_semantics<parallel>], iteration_bounds = array<i64: 2>, scalar_prefetch = 0 : i64, scratch_operands = 0 : i64, tpu.core_type = #tpu.core_type<tc>, window_params = [{transform_indices = @transform_0, window_bounds = array<i64: 1, 32, 256>}, {pipeline_mode = #tpu.pipeline_mode<synchronous>, transform_indices = @transform_1, window_bounds = array<i64: 32, 4>}, {pipeline_mode = #tpu.pipeline_mode<synchronous>, transform_indices = @transform_2, window_bounds = array<i64: 1, 4>}, {pipeline_mode = #tpu.pipeline_mode<synchronous>, transform_indices = @transform_3, window_bounds = array<i64: 4, 32>}, {pipeline_mode = #tpu.pipeline_mode<synchronous>, transform_indices = @transform_4, window_bounds = array<i64: 1, 32>}, {transform_indices = @transform_5, window_bounds = array<i64: 1, 32, 256>}]} {
    %c0 = arith.constant 0 : index
    %c0_0 = arith.constant 0 : index
    %c0_1 = arith.constant 0 : index
    %0 = vector.load %arg1[%c0, %c0_0, %c0_1] : memref<1x32x256xf32, #tpu.memory_space<vmem>>, vector<1x32x256xf32>
    %cst = arith.constant dense<0.000000e+00> : vector<1x32xf32>
    %1 = vector.multi_reduction <add>, %0, %cst [2] : vector<1x32x256xf32> to vector<1x32xf32>
    %cst_2 = arith.constant 3.906250e-03 : f32
    %2 = vector.broadcast %cst_2 : f32 to vector<1x32xf32>
    %3 = arith.mulf %1, %2 : vector<1x32xf32>
    %cst_3 = arith.constant dense<0xFF800000> : vector<1x32xf32>
    %4 = vector.multi_reduction <maximumf>, %0, %cst_3 [2] : vector<1x32x256xf32> to vector<1x32xf32>
    %c0_4 = arith.constant 0 : index
    %c0_5 = arith.constant 0 : index
    %5 = vector.load %arg2[%c0_4, %c0_5] : memref<32x4xf32, #tpu.memory_space<vmem>>, vector<32x4xf32>
    %c0_6 = arith.constant 0 : index
    %c0_7 = arith.constant 0 : index
    %6 = vector.load %arg3[%c0_6, %c0_7] : memref<1x4xf32, #tpu.memory_space<vmem>>, vector<1x4xf32>
    %c0_8 = arith.constant 0 : index
    %c0_9 = arith.constant 0 : index
    %7 = vector.load %arg4[%c0_8, %c0_9] : memref<4x32xf32, #tpu.memory_space<vmem>>, vector<4x32xf32>
    %c0_10 = arith.constant 0 : index
    %c0_11 = arith.constant 0 : index
    %8 = vector.load %arg5[%c0_10, %c0_11] : memref<1x32xf32, #tpu.memory_space<vmem>>, vector<1x32xf32>
    %cst_12 = arith.constant dense<0.000000e+00> : vector<1x4xf32>
    %9 = tpu.matmul %3, %5, %cst_12 {dimension_numbers = #tpu.dot_dimension_numbers<[1], [0], [0], [1], [0, 0, 1, 1], [], []>} : vector<1x32xf32>, vector<32x4xf32>, vector<1x4xf32> -> vector<1x4xf32>
    %10 = arith.addf %9, %6 : vector<1x4xf32>
    %cst_13 = arith.constant 0.000000e+00 : f32
    %11 = vector.broadcast %cst_13 : f32 to vector<1x4xf32>
    %12 = arith.maximumf %10, %11 : vector<1x4xf32>
    %cst_14 = arith.constant dense<0.000000e+00> : vector<1x32xf32>
    %13 = tpu.matmul %12, %7, %cst_14 {dimension_numbers = #tpu.dot_dimension_numbers<[1], [0], [0], [1], [0, 0, 1, 1], [], []>} : vector<1x4xf32>, vector<4x32xf32>, vector<1x32xf32> -> vector<1x32xf32>
    %14 = arith.addf %13, %8 : vector<1x32xf32>
    %cst_15 = arith.constant dense<0.000000e+00> : vector<1x4xf32>
    %15 = tpu.matmul %4, %5, %cst_15 {dimension_numbers = #tpu.dot_dimension_numbers<[1], [0], [0], [1], [0, 0, 1, 1], [], []>} : vector<1x32xf32>, vector<32x4xf32>, vector<1x4xf32> -> vector<1x4xf32>
    %16 = arith.addf %15, %6 : vector<1x4xf32>
    %cst_16 = arith.constant 0.000000e+00 : f32
    %17 = vector.broadcast %cst_16 : f32 to vector<1x4xf32>
    %18 = arith.maximumf %16, %17 : vector<1x4xf32>
    %cst_17 = arith.constant dense<0.000000e+00> : vector<1x32xf32>
    %19 = tpu.matmul %18, %7, %cst_17 {dimension_numbers = #tpu.dot_dimension_numbers<[1], [0], [0], [1], [0, 0, 1, 1], [], []>} : vector<1x4xf32>, vector<4x32xf32>, vector<1x32xf32> -> vector<1x32xf32>
    %20 = arith.addf %19, %8 : vector<1x32xf32>
    %21 = arith.addf %14, %20 : vector<1x32xf32>
    %22 = arith.negf %21 : vector<1x32xf32>
    %23 = math.exp %22 : vector<1x32xf32>
    %cst_18 = arith.constant 1.000000e+00 : f32
    %24 = vector.broadcast %cst_18 : f32 to vector<1x32xf32>
    %25 = arith.addf %24, %23 : vector<1x32xf32>
    %26 = arith.divf %24, %25 : vector<1x32xf32>
    %27 = vector.shape_cast %26 : vector<1x32xf32> to vector<1x32x1xf32>
    %28 = vector.broadcast %27 : vector<1x32x1xf32> to vector<1x32x256xf32>
    %29 = arith.mulf %0, %28 : vector<1x32x256xf32>
    %c0_19 = arith.constant 0 : index
    %c0_20 = arith.constant 0 : index
    %c0_21 = arith.constant 0 : index
    %30 = vector.load %arg6[%c0_19, %c0_20, %c0_21] : memref<1x32x256xf32, #tpu.memory_space<vmem>>, vector<1x32x256xf32>
    tpu.vector_store %arg6[%c0_19, %c0_20, %c0_21], %29 {strides = array<i32>} : memref<1x32x256xf32, #tpu.memory_space<vmem>>, vector<1x32x256xf32>,
    return
  }
  func.func @transform_0(%arg0: i32) -> (i32, i32, i32) {
    %c0_i32 = arith.constant 0 : i32
    %c0_i32_0 = arith.constant 0 : i32
    %c0_i32_1 = arith.constant 0 : i32
    return %arg0, %c0_i32, %c0_i32_0 : i32, i32, i32
  }
  func.func @transform_1(%arg0: i32) -> (i32, i32) {
    %c0_i32 = arith.constant 0 : i32
    %c0_i32_0 = arith.constant 0 : i32
    %c0_i32_1 = arith.constant 0 : i32
    return %c0_i32, %c0_i32_0 : i32, i32
  }
  func.func @transform_2(%arg0: i32) -> (i32, i32) {
    %c0_i32 = arith.constant 0 : i32
    %c0_i32_0 = arith.constant 0 : i32
    %c0_i32_1 = arith.constant 0 : i32
    return %c0_i32, %c0_i32_0 : i32, i32
  }
  func.func @transform_3(%arg0: i32) -> (i32, i32) {
    %c0_i32 = arith.constant 0 : i32
    %c0_i32_0 = arith.constant 0 : i32
    %c0_i32_1 = arith.constant 0 : i32
    return %c0_i32, %c0_i32_0 : i32, i32
  }
  func.func @transform_4(%arg0: i32) -> (i32, i32) {
    %c0_i32 = arith.constant 0 : i32
    %c0_i32_0 = arith.constant 0 : i32
    %c0_i32_1 = arith.constant 0 : i32
    return %c0_i32, %c0_i32_0 : i32, i32
  }
  func.func @transform_5(%arg0: i32) -> (i32, i32, i32) {
    %c0_i32 = arith.constant 0 : i32
    %c0_i32_0 = arith.constant 0 : i32
    %c0_i32_1 = arith.constant 0 : i32
    return %arg0, %c0_i32, %c0_i32_0 : i32, i32, i32
  }
}

</mosaic_0001>

<bundles_post_ra>
// kernel: tpu_custom_call.1
= control target key start
LH: loop header
LB: loop body
LE: loop exit
PB: predicated region body
PF: predicated region fallthrough
CT: control target
= control target key end

     0   :  { %10 = vsyncpa [#allocation3], 0  ;;  %s1287_s0 = inlined_call_operand.hbm [shape: f32[2,32,256], index: 0, kind: input, shape index: {}, may-alias: {0,5}]   ;;  %s1288_s1 = inlined_call_operand.vmem [shape: f32[32,4], index: 1, kind: input, shape index: {}]   ;;  %s1289_s2 = inlined_call_operand.vmem [shape: f32[1,4], index: 2, kind: input, shape index: {}]   ;;  %s1290_s3 = inlined_call_operand.vmem [shape: f32[4,32], index: 3, kind: input, shape index: {}]   ;;  %s1291_s4 = inlined_call_operand.vmem [shape: f32[1,32], index: 4, kind: input, shape index: {}]   ;;  %s1292_s5 = inlined_call_operand.hbm [shape: f32[2,32,256], index: 5, kind: output, shape index: {}, may-alias: {0,5}]  }
   0x1   :  { %12 = vsyncpa [#allocation3 + $0x1], 0 }
   0x2   :  { %13 = vsyncpa [#allocation4], 0 }
   0x3   :  { %15 = vsyncpa [#allocation4 + $0x1], 0  ;;  %s1045_s18 = smov 0   ;;  %s1047_s19 = smov 0  }
   0x4   :  { %s1049_s20 = smov 0   ;;  %s1051_s21 = smov 0  }
   0x5 LB: > { %s1066_s22 = sadd.s32 4294967295, %s1004_s21   ;;  %s767_s23 = sadd.s32 4294967294, %s1004_s21   ;;  %s1004_s21 = sphi %s1051_s21, %s1305_s21   ;;  %s1000_s20 = sphi %s1049_s20, %s1304_s20   ;;  %s996_s19 = sphi %s1047_s19, %s1303_s19   ;;  %s992_s18 = sphi %s1045_s18, %s1302_s18  }
   0x6   : > { %s1070_s24 = sadd.s32 1, %s1004_s21   ;;  %s28_s25 = sadd.s32 1, %s1000_s20 }
   0x7   : > { %s25_s26 = ssub.s32 %s1004_s21, %s1070_s24  ;;  %p35_p0 = scmp.ne.s32.totalorder %s1000_s20, %s996_s19 }
   0x8   : > { %p26_p1 = scmp.eq.s32.totalorder %s25_s26, 0  ;;  %p36_p2 = scmp.eq.s32.totalorder %s1004_s21, 0 }
   0x9   : > { %p41_p3 = scmp.ne.s32.totalorder %s996_s19, %s992_s18  ;;  %p42_p4 = scmp.eq.s32.totalorder %s1066_s22, 0 }
   0xa   : > { %s1082_s27 = scalar_select %p26_p1, %s1000_s20, %s28_s25  }
   0xb   : > { %p1084_p5 = por %p36_p2, %p35_p0  ;;  %p1088_p6 = por %p42_p4, %p41_p3 }
   0xc   : > { %p149_p7 = scmp.eq.s32.totalorder %s1066_s22, 1  ;;  %p155_p8 = scmp.eq.s32.totalorder %s767_s23, 1 }
   0xd   : > { %p863_p10 = scmp.lt.s32.totalorder %s1004_s21, 2  ;;  %s187_s7 = sand.u32 1, %s1000_s20  }
   0xe   : > { %p1095_p11 = por %p149_p7, %p35_p0  ;;  %p1099_p12 = por %p155_p8, %p41_p3 }
   0xf   : > { %s788_s8 = sshll.u32 %s1004_s21, 10  ;;  %s770_s9 = sshll.u32 %s187_s7, 6 }
  0x10   : > { %s1296_s30 = scalar_select %p1095_p11, 1, 0 }
  0x11   : > { %s1297_s6 = scalar_select %p1099_p12, 1, 0 }
  0x12   : > { %s1108_s12 = scalar_lea.hbm %s1287_s0, %s788_s8  ;;  %s191_s13 = scalar_lea.vmem [#allocation2], %s770_s9 }
  0x13   : > { %s198_s14 = sshll.u32 %s191_s13, 4  ;;  %p1112_p13 = pnand %p863_p10, %p1084_p5  ;;  %s1116_s14 = int_to_ptr.vmem [resolvable:$true] %s198_s14 }
  0x14   : > { %s1118_s16 = scalar_lea.sflag [#allocation3], %s187_s7  ;;  %s908_s17 = scalar_lea.hbm %s1108_s12, 1024 }
  0x15   : > { %p909_p0 = scmp.ne.s32.totalorder %s1108_s12, %s908_s17  ;;  %p910_p1 = pneg %p1112_p13 }
  0x16   : > { %s913_s26 = scalar_lea.hbm %s1287_s0, 2048  ;;  %p914_p4 = scmp.lt.u32.totalorder %s1108_s12, %s1287_s0 }
  0x17   : > { %p911_p2 = pnand %p910_p1, %p909_p0  ;;  %p915_p5 = scmp.lt.u32.totalorder %s913_s26, %s908_s17 }
  0x18   : > { %p917_p8 = scmp.lt.u32.totalorder %s908_s17, %s1108_s12 }
  0x19   : > { %p912_p3 = pneg %p911_p2  ;;  %p916_p7 = por %p915_p5, %p914_p4 }
  0x1b   : > { %p918_p10 = por %p917_p8, %p916_p7 }
  0x1d   : > { %p919_p9 = pnand %p918_p10, %p912_p3 }
  0x1f   : > { %922 = shalt.err (!%p919_p9)
}
  0x20   : > { %s923_s7 = scalar_lea.vmem %s1116_s14, 1024  ;;  %s1006_s9 = smov [#allocation2]  }
  0x21   : > { %p924_p0 = scmp.ne.s32.totalorder %s1116_s14, %s923_s7  ;;  %s928_s10 = sshll.u32 %s1006_s9, 4  ;;  %s929_s10 = int_to_ptr.vmem [resolvable:$false] %s928_s10 }
  0x22   : > { %s930_s11 = scalar_lea.vmem %s929_s10, 2048  ;;  %p931_p11 = scmp.lt.s32.totalorder %s1116_s14, %s929_s10 }
  0x23   : > { %p926_p2 = pnand %p924_p0, %p910_p1  ;;  %p932_p4 = scmp.lt.s32.totalorder %s930_s11, %s923_s7 }
  0x25   : > { %p927_p12 = pneg %p926_p2  ;;  %p933_p5 = por %p932_p4, %p931_p11 }
  0x27   : > { %p934_p7 = pnand %p933_p5, %p927_p12 }
  0x29   : > { %937 = shalt.err (!%p934_p7)
}
  0x2a   : > { %s1007_s13 = smov 256   ;;  %s1008_s17 = smov 16  }
  0x2b   : > { %858 = dma.hbm_to_vmem [thread:$0]  (!%p1112_p13), %s1108_s12, 1024, %s1116_s14, %s1118_s16, %s1007_s13, %s1007_s13, %s1008_s17  }
  0x2c   : > { %p773_p9 = scmp.ge.s32.totalorder %s1004_s21, 1  ;;  %p206_p1 = scmp.lt.s32.totalorder %s1004_s21, 3 }
  0x2e   : > { %p207_p3 = pnand %p773_p9, %p206_p1 }
  0x2f   : > { %s1149_s23 = sand.u32 (!%p207_p3), 1, %s996_s19  }
  0x30   : > { %210 = sbr.rel (%p207_p3) target bundleno = 816 (0x330), region = 40  ;;  %s774_s25 = sshll.u32 (!%p207_p3), %s1149_s23, 6 }
  0x31   : > { %s213_s26 = scalar_lea.sflag (!%p207_p3), [#allocation3], %s1149_s23  ;;  %s216_s28 = scalar_lea.vmem (!%p207_p3), [#allocation2], %s774_s25 }
  0x37   : > { %983 = dma.done.wait (%p1088_p6), %s213_s26, 1024  }
  0x38   : > { %985 = vsyncadd (%p1088_p6), %s213_s26, 4294966272  ;;  %v1159_v0 = vld [vmem:[%s216_s28 + $0x20] sm:$0xff]  ;;  %v1161_v1 = vld [vmem:[%s216_s28 + $0x28] sm:$0xff]  ;;  %v1009_v19 = vmov 0.0|0.0   ;;  %vm1010_vm0 = vmmov 0   ;;  %v1011_v23 = vmov 0.0   ;;  %v290_v24 = vlaneseq }
  0x39   : > { %v1163_v2 = vld [vmem:[%s216_s28] sm:$0xff]  ;;  %v257_v3 = vadd.f32 %v1161_v1, %v1159_v0  ;;  %v1167_v4 = vld [vmem:[%s216_s28 + $0x8] sm:$0xff]  ;;  %v1169_v5 = vld [vmem:[%s216_s28 + $0x30] sm:$0xff]  ;;  %v273_v15 = vmax.f32 %v1159_v0, %v1161_v1  ;;  %836 = vmatprep.subr.bf16.mxu0 %v1009_v19  ;;  %842 = vmatprep.subr.bf16.mxu1 %v1009_v19  ;;  %vm301_vm1 = vcmask 130112   ;;  %vm308_vm2 = vcmask 195712   ;;  %s242_s29 = scalar_lea.vmem [#allocation5], %s774_s25 }
  0x3a   : > { %v1171_v6 = vld [vmem:[%s216_s28 + $0x38] sm:$0xff]  ;;  %v251_v7 = vadd.f32 %v1167_v4, %v1163_v2  ;;  %v1175_v8 = vld [vmem:[%s216_s28 + $0x10] sm:$0xff]  ;;  %v267_v13 = vmax.f32 %v1163_v2, %v1167_v4  ;;  %v279_v16 = vld [vmem:[%s1288_s1] sm:$0xff]  ;;  %812 = vmatprep.mubr.msk.f32.mxu0 %vm1010_vm0, %v1011_v23  ;;  %828 = vmatprep.mubr.msk.f32.mxu1 %vm1010_vm0, %v1011_v23  ;;  %v291_v25 = vand.u32 127, %v290_v24  ;;  %v1205_v26 = vshrl.u32 %v290_v24, 7  ;;  %s694_s12 = sshll.u32 %s242_s29, 4  ;;  %s1236_s12 = int_to_ptr.vmem [resolvable:$true] %s694_s12 }
  0x3b   : > { %v1177_v9 = vld [vmem:[%s216_s28 + $0x18] sm:$0xff]  ;;  %258 = vadd.xlane.f32.xlu1 %v257_v3  ;;  %v260_v10 = vadd.f32 %v1171_v6, %v1169_v5  ;;  %v276_v14 = vmax.f32 %v1169_v5, %v1171_v6  ;;  %v280_v17 = vld [vmem:[%s1288_s1 + $0x8] sm:$0xff]  ;;  %v281_v20 = vld [vmem:[%s1288_s1 + $0x10] sm:$0xff]  ;;  %vm315_vm3 = vcmask 261312   ;;  %vm317_vm4 = vcmask 261120   ;;  %s789_s14 = sshll.u32 %s1066_s22, 10 }
  0x3c   : > { %252 = vadd.xlane.f32.xlu0 %v251_v7  ;;  %v254_v11 = vadd.f32 %v1177_v9, %v1175_v8  ;;  %v270_v12 = vmax.f32 %v1175_v8, %v1177_v9  ;;  %v837_v18 = vpack.c.bf16 %v280_v17, %v279_v16  ;;  %v282_v21 = vld [vmem:[%s1288_s1 + $0x18] sm:$0xff]  ;;  %v310_v28 = vadd.s32 4294967272, %v291_v25  ;;  %v284_v60 = vld [vmem:[%s1290_s3] sm:$0xf]  ;;  %s1241_s16 = scalar_lea.hbm %s1292_s5, %s789_s14  ;;  %s681_s22 = scalar_lea.sflag [#allocation4], %s1149_s23 }
  0x3d   : > { %v840_v22 = vpack.c.bf16 %v282_v21, %v281_v20  ;;  %v296_v29 = vadd.s32 4294967288, %v291_v25  ;;  %v303_v30 = vadd.s32 4294967280, %v291_v25  ;;  %v294_v32 = vsub.s32 %v291_v25, %v1205_v26  ;;  %v283_v61 = vld [vmem:[%s1289_s2] sm:$0x1]  ;;  %s938_s8 = scalar_lea.vmem %s1236_s12, 1024  ;;  %p1299_p11 = scmp.ne.s32.totalorder %s1296_s30, 0 }
  0x3e   : > { %838 = vmatpush3.bf16.msra.mxu0 %v837_v18  ;;  %844 = vmatpush3.bf16.msra.mxu1 %v837_v18  ;;  %v313_v34 = vsub.s32 %v310_v28, %v1205_v26  ;;  %vm395_vm5 = vcmask 1043456   ;;  %vm391_vm6 = vcmask 31744   ;;  %v647_v25 = vsub.s32 0, %v1205_v26  ;;  %p939_p6 = scmp.ne.s32.totalorder %s1236_s12, %s938_s8  ;;  %s1012_s7 = smov [#allocation5]  }
  0x3f   : > { %261 = vadd.xlane.f32.xlu1 %v260_v10  ;;  %839 = vmatprep.subr.bf16.mxu0 %v1009_v19  ;;  %v299_v36 = vsub.s32 %v296_v29, %v1205_v26  ;;  %v306_v37 = vsub.s32 %v303_v30, %v1205_v26  ;;  %s942_s9 = sshll.u32 %s1012_s7, 4  ;;  %s943_s9 = int_to_ptr.vmem [resolvable:$false] %s942_s9 }
  0x40   : > { %255 = vadd.xlane.f32.xlu0 %v254_v11  ;;  %845 = vmatprep.subr.bf16.mxu1 %v1009_v19  ;;  %p940_p12 = pnand %p939_p6, %p1299_p11  ;;  %s944_s10 = scalar_lea.vmem %s943_s9, 2048 }
  0x41   : > { %p945_p8 = scmp.lt.s32.totalorder %s1236_s12, %s943_s9  ;;  %p946_p10 = scmp.lt.s32.totalorder %s944_s10, %s938_s8 }
  0x42   : > { %841 = vmatpush3.bf16.msra.mxu0 %v840_v22  ;;  %847 = vmatpush3.bf16.msra.mxu1 %v840_v22  ;;  %p941_p13 = pneg %p940_p12 }
  0x43   : > { %271 = vmax.xlane.f32.xlu1 %v270_v12  ;;  %815 = vmatprep.subr.mxu0 %v1011_v23  ;;  %p947_p0 = por %p946_p10, %p945_p8 }
  0x44   : > { %268 = vmax.xlane.f32.xlu0 %v267_v13  ;;  %831 = vmatprep.subr.mxu1 %v1011_v23 }
  0x45   : > { %p948_p2 = pnand %p947_p0, %p941_p13 }
  0x47   : > { %277 = vmax.xlane.f32.xlu1 %v276_v14  ;;  %v285_v14 = vld [vmem:[%s1291_s4] sm:$0x1] }
  0x48   : > { %274 = vmax.xlane.f32.xlu0 %v273_v15  ;;  %v848_v16 = vadd.f32 %v285_v14, %v285_v14 }
  0xc8   : > { %v259_v27 = vpop.xlane.xlu1 %258 }
  0xc9   : > { %v253_v31 = vpop.xlane.xlu0 %252  ;;  %v265_v38 = vmul.f32 0.00390625, %v259_v27 }
  0xca   : > { %v263_v33 = vmul.f32 0.00390625, %v253_v31 }
  0xcb   : > { %v307_v46 = vrot.slane %v265_v38, %v306_v37 }
  0xcc   : > { %v262_v35 = vpop.xlane.xlu1 %261  ;;  %v295_v42 = vrot.slane %v263_v33, %v294_v32 }
  0xcd   : > { %v266_v39 = vmul.f32 0.00390625, %v262_v35  ;;  %v256_v40 = vpop.xlane.xlu0 %255 }
  0xce   : > { %v264_v41 = vmul.f32 0.00390625, %v256_v40 }
  0xcf   : > { %v314_v43 = vrot.slane %v266_v39, %v313_v34 }
  0xd0   : > { %v300_v44 = vrot.slane %v264_v41, %v299_v36  ;;  %v272_v45 = vpop.xlane.xlu1 %271 }
  0xd1   : > { %v269_v47 = vpop.xlane.xlu0 %268  ;;  %v480_v49 = vrot.slane %v272_v45, %v299_v36 }
  0xd2   : > { %v302_v48 = vsel %vm301_vm1, %v300_v44, %v295_v42  ;;  %v476_v50 = vrot.slane %v269_v47, %v294_v32 }
  0xd3   : > { %v309_v51 = vsel %vm308_vm2, %v307_v46, %v302_v48 }
  0xd4   : > { %v316_v52 = vsel %vm315_vm3, %v314_v43, %v309_v51  ;;  %v278_v53 = vpop.xlane.xlu1 %277  ;;  %v481_v57 = vsel %vm301_vm1, %v480_v49, %v476_v50 }
  0xd5   : > { %813 = vmatmul.mubr.msk.f32.vlgmr.msra.gmra.mrb[0].mxu0 %vm317_vm4, %v316_v52  ;;  %v275_v54 = vpop.xlane.xlu0 %274  ;;  %v490_v55 = vrot.slane %v278_v53, %v313_v34 }
  0xd6   : > { %v485_v56 = vrot.slane %v275_v54, %v306_v37  ;;  %817 = vmatprep.mubr.msk.f32.mxu0 %vm1010_vm0, %v1011_v23  ;;  %816 = vmatpush3.msk.msra.mxu0 %vm395_vm5, %v284_v60 }
  0xd8   : > { %v486_v58 = vsel %vm308_vm2, %v485_v56, %v481_v57 }
  0xd9   : > { %v491_v59 = vsel %vm315_vm3, %v490_v55, %v486_v58 }
  0xda   : > { %829 = vmatmul.mubr.msk.f32.vlgmr.msra.gmra.mrb[0].mxu1 %vm317_vm4, %v491_v59 }
  0xdb   : > { %833 = vmatprep.mubr.msk.f32.mxu1 %vm1010_vm0, %v1011_v23  ;;  %832 = vmatpush3.msk.msra.mxu1 %vm395_vm5, %v284_v60 }
 0x1a8   : > { %v386_v62 = vpop.f32.mrb[0].mxu0 }
 0x1a9   : > { %v387_v63 = vadd.f32 %v386_v62, %v283_v61  ;;  %v814_v3 = vpop.f32.mrb[1].mxu0 }
 0x1ab   : > { %v390_v7 = vmax.f32 %v387_v63, 0.0 }
 0x1ad   : > { %818 = vmatmul.mubr.msk.f32.vlgmr.msra.gmra.mrb[2].mxu0 %vm391_vm6, %v390_v7  ;;  %v560_v10 = vpop.f32.mrb[0].mxu1 }
 0x1ae   : > { %v561_v11 = vadd.f32 %v560_v10, %v283_v61  ;;  %v830_v12 = vpop.f32.mrb[1].mxu1 }
 0x1b0   : > { %v564_v13 = vmax.f32 %v561_v11, 0.0 }
 0x1b2   : > { %834 = vmatmul.mubr.msk.f32.vlgmr.msra.gmra.mrb[2].mxu1 %vm391_vm6, %v564_v13 }
 0x280   : > { %v465_v15 = vpop.f32.mrb[2].mxu0 }
 0x281   : > { %v819_v17 = vpop.f32.mrb[3].mxu0  ;;  %v849_v18 = vadd.f32 %v848_v16, %v465_v15 }
 0x285   : > { %v634_v19 = vpop.f32.mrb[2].mxu1 }
 0x286   : > { %v850_v20 = vadd.f32 %v849_v18, %v634_v19  ;;  %v835_v21 = vpop.f32.mrb[3].mxu1 }
 0x288   : > { %v782_v22 = vmul.f32 -1.442695, %v850_v20 }
 0x28a   : > { %904 = vpow2.f32 %v782_v22 }
 0x294   : > { %v905_v23 = vpop.eup %904 }
 0x295   : > { %v642_v24 = vadd.f32 1.0, %v905_v23 }
 0x297   : > { %906 = vrcp.f32 %v642_v24 }
 0x2a1   : > { %v907_v27 = vpop.eup %906 }
 0x2a2   : > { %v648_v28 = vrot.slane %v907_v27, %v647_v25 }
 0x2a4   : > { %654 = vbcast.lane.b32.xlu1 %v648_v28, 264  ;;  %650 = vbcast.lane.b32.xlu0 %v648_v28, 256 }
 0x2a8   : > { %658 = vbcast.lane.b32.xlu1 %v648_v28, 272 }
 0x2ac   : > { %662 = vbcast.lane.b32.xlu1 %v648_v28, 280 }
 0x316   : > { %v655_v29 = vpop.permute.xlu1 %654  ;;  %v651_v30 = vpop.permute.xlu0 %650 }
 0x317   : > { %v666_v31 = vmul.f32 %v655_v29, %v1175_v8  ;;  %v667_v32 = vmul.f32 %v655_v29, %v1177_v9  ;;  %v664_v33 = vmul.f32 %v651_v30, %v1163_v2  ;;  %v665_v34 = vmul.f32 %v651_v30, %v1167_v4 }
 0x319   : > { %674 = vst [vmem:[%s242_s29 + $0x10] sm:$0xff] %v666_v31  ;;  %675 = vst [vmem:[%s242_s29 + $0x18] sm:$0xff] %v667_v32 }
 0x31a   : > { %672 = vst [vmem:[%s242_s29] sm:$0xff] %v664_v33  ;;  %673 = vst [vmem:[%s242_s29 + $0x8] sm:$0xff] %v665_v34  ;;  %v659_v26 = vpop.permute.xlu1 %658 }
 0x31b   : > { %v668_v35 = vmul.f32 %v659_v26, %v1159_v0  ;;  %v669_v8 = vmul.f32 %v659_v26, %v1161_v1 }
 0x31d   : > { %676 = vst [vmem:[%s242_s29 + $0x20] sm:$0xff] %v668_v35  ;;  %677 = vst [vmem:[%s242_s29 + $0x28] sm:$0xff] %v669_v8 }
 0x31e   : > { %v663_v2 = vpop.permute.xlu1 %662 }
 0x31f   : > { %v670_v4 = vmul.f32 %v663_v2, %v1169_v5  ;;  %v671_v0 = vmul.f32 %v663_v2, %v1171_v6 }
 0x321   : > { %678 = vst [vmem:[%s242_s29 + $0x30] sm:$0xff] %v670_v4  ;;  %679 = vst [vmem:[%s242_s29 + $0x38] sm:$0xff] %v671_v0 }
 0x322   : > { %951 = shalt.err (!%p948_p2)
}
 0x323   : > { %s952_s11 = scalar_lea.hbm %s1241_s16, 1024  ;;  %s956_s26 = scalar_lea.hbm %s1292_s5, 2048 }
 0x324   : > { %p953_p4 = scmp.ne.s32.totalorder %s1241_s16, %s952_s11  ;;  %p957_p9 = scmp.lt.u32.totalorder %s1241_s16, %s1292_s5 }
 0x325   : > { %p958_p1 = scmp.lt.u32.totalorder %s956_s26, %s952_s11  ;;  %p960_p6 = scmp.lt.u32.totalorder %s952_s11, %s1241_s16 }
 0x326   : > { %p954_p5 = pnand %p953_p4, %p1299_p11 }
 0x327   : > { %p959_p3 = por %p958_p1, %p957_p9 }
 0x328   : > { %p955_p7 = pneg %p954_p5 }
 0x329   : > { %p961_p12 = por %p960_p6, %p959_p3 }
 0x32b   : > { %p962_p13 = pnand %p961_p12, %p955_p7 }
 0x32d   : > { %965 = shalt.err (!%p962_p13)
}
 0x32e   : > { %s1013_s14 = smov 256   ;;  %s1014_s25 = smov 16  }
 0x32f   : > { %853 = dma.vmem_to_hbm [thread:$0]  (%p1299_p11), %s1236_s12, 1024, %s1241_s16, %s681_s22, %s1013_s14, %s1013_s14, %s1014_s25  }
 0x330 PF: > { %s709_s15 = sand.u32 1, %s992_s18   ;;  %p1300_p8 = scmp.ne.s32.totalorder %s1297_s6, 0 }
 0x331   : > { %p1301_p10 = scmp.ge.s32.totalorder %s1004_s21, 2  ;;  %s710_s8 = scalar_lea.sflag [#allocation4], %s709_s15 }
 0x333   : > { %p860_p0 = pnand %p1301_p10, %p1300_p8 }
 0x335   : > { %987 = dma.done.wait (!%p860_p0), %s710_s8, 1024  }
 0x336   : > { %989 = vsyncadd (!%p860_p0), %s710_s8, 4294966272  ;;  %p18_p2 = scmp.ge.s32.totalorder %s1070_s24, 4   ;;  %s1302_s18 = smov %s996_s19 }
 0x337   : > { %s1303_s19 = smov %s1000_s20  ;;  %s1304_s20 = smov %s1082_s27 }
 0x338   : > { %s1305_s21 = smov %s1070_s24  ;;  %20 = sbr.rel (!%p18_p2) target bundleno = 5 (0x5), region = 85 }
 0x33f   :  { %715 = vsyncpa [#allocation3], 1 }
 0x340   :  { %717 = vsyncpa [#allocation3 + $0x1], 1 }
 0x341   :  { %718 = vsyncpa [#allocation4], 1 }
 0x342   :  { %720 = vsyncpa [#allocation4 + $0x1], 1 }

</bundles_post_ra>
